<compile_context>
chip_gen: v5e
topology: v5e:2x2
jax: 0.10.0
libtpu: 0.0.40
codegen_flags: <defaults>
</compile_context>

<pallas_src>
import functools

import jax
import jax.numpy as jnp
from jax import lax
from jax.experimental import pallas as pl
from jax.experimental.pallas import tpu as pltpu


def _round_up(a, m):
    return (a + m - 1) // m * m


def critic_head_kernel(x_ref, w_ref, b_ref, o_ref, acc_ref, *,
                       d_total, tile_d, needs_d_mask):
    # x_ref: (TB, TD) VMEM   w_ref: (1, TD) VMEM   b_ref: (1, 1) SMEM
    # o_ref: (TB, 1) VMEM    acc_ref: (TB, 1) f32 VMEM scratch (resident over k)
    k = pl.program_id(1)

    @pl.when(k == 0)
    def _():
        acc_ref[...] = jnp.zeros_like(acc_ref)

    x = x_ref[...].astype(jnp.float32)        # upcast also covers bf16 streaming
    w = w_ref[...].astype(jnp.float32)
    prod = x * w                              # VPU
    if needs_d_mask:
        # Last feature chunk may read past D: zero those lanes (stale VMEM could
        # hold anything, incl. NaN, so mask the product, not the inputs).
        col = lax.broadcasted_iota(jnp.int32, prod.shape, 1) + k * tile_d
        prod = jnp.where(col < d_total, prod, 0.0)
    # XLU lane reduce; MXU stays idle.
    acc_ref[...] += jnp.sum(prod, axis=-1, keepdims=True)

    @pl.when(k == pl.num_programs(1) - 1)
    def _():
        o_ref[...] = (acc_ref[...] + b_ref[0, 0]).astype(o_ref.dtype)


def critic_head(x, w_row, b, *, tile_b=None, tile_d=None):
    """Forward of CriticHead: y = x @ w_row.T + b.

    x:     (..., D) activations (f32 or bf16), like nn.Linear.
    w_row: (1, D) weight row (PyTorch fc.weight layout, NOT transposed).
    b:     bias, scalar or shape (1,).
    Returns (..., 1) in x.dtype.
    """
    orig_shape = x.shape
    D = orig_shape[-1]
    x2 = x.reshape(-1, D)
    B = x2.shape[0]
    itemsize = jnp.dtype(x2.dtype).itemsize

    # ---- tile selection: keep a single x tile <= ~8 MiB (16 MiB double-buffered)
    x_tile_budget = 8 * 1024 * 1024
    if tile_d is None:
        if D * itemsize * 8 <= x_tile_budget:     # whole feature dim beside >=8 rows
            tile_d = D
        else:                                     # chunk D in multiples of 128 lanes
            tile_d = max(128, (x_tile_budget // (8 * itemsize)) // 128 * 128)
    if tile_b is None:
        tile_b = x_tile_budget // max(1, tile_d * itemsize)
        # Cap at 1024: (TILE_B, 1) buffers are lane-padded to 128 in VMEM, so the
        # accumulator + double-buffered output cost 512*TILE_B bytes each.
        tile_b = max(8, min(1024, (tile_b // 8) * 8))
    tile_b = min(tile_b, _round_up(B, 8))

    b2 = jnp.reshape(b, (1, 1)).astype(jnp.float32)

    grid = (pl.cdiv(B, tile_b), pl.cdiv(D, tile_d))
    needs_d_mask = (D % tile_d) != 0

    # VMEM need: 2x x tile + 2x weight row (sublane-padded) + 2x out col +
    # 1x accumulator col (both lane-padded to 128) + slack.
    col_buf = tile_b * 128 * 4
    need = (2 * tile_b * tile_d * itemsize
            + 2 * 8 * tile_d * 4
            + 3 * col_buf
            + (2 << 20))
    vmem_limit = int(min(max(need, 4 << 20), 32 << 20))   # safe on v5e/v6e/v7x

    kernel = functools.partial(critic_head_kernel,
                               d_total=D, tile_d=tile_d,
                               needs_d_mask=needs_d_mask)

    out = pl.pallas_call(
        kernel,
        out_shape=jax.ShapeDtypeStruct((B, 1), x2.dtype),
        grid_spec=pltpu.PrefetchScalarGridSpec(
            num_scalar_prefetch=0,
            grid=grid,
            in_specs=[
                pl.BlockSpec((tile_b, tile_d), lambda i, k: (i, k)),
                pl.BlockSpec((1, tile_d), lambda i, k: (0, k)),
                pl.BlockSpec((1, 1), lambda i, k: (0, 0), memory_space=pltpu.SMEM),
            ],
            out_specs=pl.BlockSpec((tile_b, 1), lambda i, k: (i, 0)),
            scratch_shapes=[pltpu.VMEM((tile_b, 1), jnp.float32)],
        ),
        compiler_params=pltpu.CompilerParams(
            dimension_semantics=("parallel", "arbitrary"),
            vmem_limit_bytes=vmem_limit,
        ),
        cost_estimate=pl.CostEstimate(
            flops=2 * B * D,
            transcendentals=0,
            bytes_accessed=B * D * itemsize
            + D * jnp.dtype(w_row.dtype).itemsize
            + B * jnp.dtype(x2.dtype).itemsize,
        ),
    )(x2, w_row, b2)

    return out.reshape(orig_shape[:-1] + (1,))


def init_critic_head_params(key, input_size):
    # nn.init.orthogonal_ on a (1, input_size) matrix == unit-norm random row.
    w = jax.random.normal(key, (1, input_size), dtype=jnp.float32)
    w = w / jnp.linalg.norm(w)
    b = jnp.zeros((1,), dtype=jnp.float32)
    return w, b


if __name__ == "__main__":
    key = jax.random.PRNGKey(0)
    k_w, k_x1, k_x2, k_x3, k_w2, k_x4 = jax.random.split(key, 6)

    # Case 1: D fits one tile, single batch tile.
    D = 32
    w, b = init_critic_head_params(k_w, D)
    x1 = jax.random.normal(k_x1, (8, D), dtype=jnp.float32)
    out1 = jax.block_until_ready(critic_head(x1, w, b))
    ref1 = x1 @ w.T + b
    assert out1.shape == (8, 1)
    assert jnp.allclose(out1, ref1, atol=1e-5, rtol=1e-5)

    # Case 2: multiple batch tiles ("parallel" batch axis + resident accumulator).
    x2 = jax.random.normal(k_x2, (24, D), dtype=jnp.float32)
    out2 = jax.block_until_ready(critic_head(x2, w, b, tile_b=8))
    ref2 = x2 @ w.T + b
    assert out2.shape == (24, 1)
    assert jnp.allclose(out2, ref2, atol=1e-5, rtol=1e-5)

    # Case 3: batch not a multiple of the tile (no host padding; masked boundary write).
    x3 = jax.random.normal(k_x3, (13, D), dtype=jnp.float32)
    out3 = jax.block_until_ready(critic_head(x3, w, b, tile_b=8))
    ref3 = x3 @ w.T + b
    assert out3.shape == (13, 1)
    assert jnp.allclose(out3, ref3, atol=1e-5, rtol=1e-5)

    # Case 4: chunked feature dim with a remainder (in-kernel lane-mask path).
    D2 = 300
    w2, b2 = init_critic_head_params(k_w2, D2)
    x4 = jax.random.normal(k_x4, (16, D2), dtype=jnp.float32)
    out4 = jax.block_until_ready(critic_head(x4, w2, b2, tile_b=8, tile_d=128))
    ref4 = x4 @ w2.T + b2
    assert out4.shape == (16, 1)
    assert jnp.allclose(out4, ref4, atol=1e-4, rtol=1e-5)

    print("KERNEL_OK")
</pallas_src>

<mosaic_0001>
module attributes {stable_mosaic.version = 11 : i64} {
  func.func @critic_head_kernel(%arg0: i32, %arg1: i32, %arg2: memref<8x32xf32, #tpu.memory_space<vmem>>, %arg3: memref<1x32xf32, #tpu.memory_space<vmem>>, %arg4: memref<1x1xf32, #tpu.memory_space<smem>>, %arg5: memref<8x1xf32, #tpu.memory_space<vmem>>, %arg6: memref<8x1xf32, #tpu.memory_space<vmem>>) attributes {dimension_semantics = [#tpu.dimension_semantics<parallel>, #tpu.dimension_semantics<arbitrary>], iteration_bounds = array<i64: 1, 1>, scalar_prefetch = 0 : i64, scratch_operands = 1 : i64, tpu.core_type = #tpu.core_type<tc>, window_params = [{transform_indices = @transform_0, window_bounds = array<i64: 8, 32>}, {transform_indices = @transform_1, window_bounds = array<i64: 1, 32>}, {transform_indices = @transform_2, window_bounds = array<i64: 1, 1>}, {transform_indices = @transform_3, window_bounds = array<i64: 8, 1>}]} {
    %c0_i32 = arith.constant 0 : i32
    %0 = arith.cmpi eq, %arg1, %c0_i32 : i32
    %1 = arith.extui %0 : i1 to i32
    %c0_i32_0 = arith.constant 0 : i32
    %2 = arith.cmpi ne, %1, %c0_i32_0 : i32
    scf.if %2 {
      %cst_10 = arith.constant 0.000000e+00 : f32
      %15 = vector.broadcast %cst_10 : f32 to vector<8x1xf32>
      %c0_11 = arith.constant 0 : index
      %c0_12 = arith.constant 0 : index
      %16 = vector.load %arg6[%c0_11, %c0_12] : memref<8x1xf32, #tpu.memory_space<vmem>>, vector<8x1xf32>
      tpu.vector_store %arg6[%c0_11, %c0_12], %15 {strides = array<i32>} : memref<8x1xf32, #tpu.memory_space<vmem>>, vector<8x1xf32>,
    } else {
    }
    %c0 = arith.constant 0 : index
    %c0_1 = arith.constant 0 : index
    %3 = vector.load %arg2[%c0, %c0_1] : memref<8x32xf32, #tpu.memory_space<vmem>>, vector<8x32xf32>
    %c0_2 = arith.constant 0 : index
    %c0_3 = arith.constant 0 : index
    %4 = vector.load %arg3[%c0_2, %c0_3] : memref<1x32xf32, #tpu.memory_space<vmem>>, vector<1x32xf32>
    %5 = vector.broadcast %4 : vector<1x32xf32> to vector<8x32xf32>
    %6 = arith.mulf %3, %5 : vector<8x32xf32>
    %c0_4 = arith.constant 0 : index
    %c0_5 = arith.constant 0 : index
    %7 = vector.load %arg6[%c0_4, %c0_5] : memref<8x1xf32, #tpu.memory_space<vmem>>, vector<8x1xf32>
    %cst = arith.constant dense<0.000000e+00> : vector<8xf32>
    %8 = vector.multi_reduction <add>, %6, %cst [1] : vector<8x32xf32> to vector<8xf32>
    %9 = vector.shape_cast %8 : vector<8xf32> to vector<8x1xf32>
    %10 = arith.addf %7, %9 : vector<8x1xf32>
    %c0_6 = arith.constant 0 : index
    %c0_7 = arith.constant 0 : index
    %11 = vector.load %arg6[%c0_6, %c0_7] : memref<8x1xf32, #tpu.memory_space<vmem>>, vector<8x1xf32>
    tpu.vector_store %arg6[%c0_6, %c0_7], %10 {strides = array<i32>} : memref<8x1xf32, #tpu.memory_space<vmem>>, vector<8x1xf32>,
    %c0_i32_8 = arith.constant 0 : i32
    %12 = arith.cmpi eq, %arg1, %c0_i32_8 : i32
    %13 = arith.extui %12 : i1 to i32
    %c0_i32_9 = arith.constant 0 : i32
    %14 = arith.cmpi ne, %13, %c0_i32_9 : i32
    scf.if %14 {
      %c0_10 = arith.constant 0 : index
      %c0_11 = arith.constant 0 : index
      %15 = vector.load %arg6[%c0_10, %c0_11] : memref<8x1xf32, #tpu.memory_space<vmem>>, vector<8x1xf32>
      %c0_12 = arith.constant 0 : index
      %c0_13 = arith.constant 0 : index
      %16 = memref.load %arg4[%c0_12, %c0_13] : memref<1x1xf32, #tpu.memory_space<smem>>
      %17 = vector.broadcast %16 : f32 to vector<8x1xf32>
      %18 = arith.addf %15, %17 : vector<8x1xf32>
      %c0_14 = arith.constant 0 : index
      %c0_15 = arith.constant 0 : index
      %19 = vector.load %arg5[%c0_14, %c0_15] : memref<8x1xf32, #tpu.memory_space<vmem>>, vector<8x1xf32>
      tpu.vector_store %arg5[%c0_14, %c0_15], %18 {strides = array<i32>} : memref<8x1xf32, #tpu.memory_space<vmem>>, vector<8x1xf32>,
    } else {
    }
    return
  }
  func.func @transform_0(%arg0: i32, %arg1: i32) -> (i32, i32) {
    %c0_i32 = arith.constant 0 : i32
    return %arg0, %arg1 : i32, i32
  }
  func.func @transform_1(%arg0: i32, %arg1: i32) -> (i32, i32) {
    %c0_i32 = arith.constant 0 : i32
    %c0_i32_0 = arith.constant 0 : i32
    return %c0_i32, %arg1 : i32, i32
  }
  func.func @transform_2(%arg0: i32, %arg1: i32) -> (i32, i32) {
    %c0_i32 = arith.constant 0 : i32
    %c0_i32_0 = arith.constant 0 : i32
    %c0_i32_1 = arith.constant 0 : i32
    return %c0_i32, %c0_i32_0 : i32, i32
  }
  func.func @transform_3(%arg0: i32, %arg1: i32) -> (i32, i32) {
    %c0_i32 = arith.constant 0 : i32
    %c0_i32_0 = arith.constant 0 : i32
    return %arg0, %c0_i32 : i32, i32
  }
}

</mosaic_0001>

<bundles_post_ra>
// kernel: tpu_custom_call.1
= control target key start
LH: loop header
LB: loop body
LE: loop exit
PB: predicated region body
PF: predicated region fallthrough
CT: control target
= control target key end

     0   :  { %9 = vsyncpa [#allocation5], 0  ;;  %s91_s15 = smov [#allocation4]   ;;  %s128_s0 = inlined_call_operand.hbm [shape: f32[8,32], index: 0, kind: input, shape index: {}]   ;;  %s129_s1 = inlined_call_operand.vmem [shape: f32[1,32], index: 1, kind: input, shape index: {}]   ;;  %s130_s2 = inlined_call_operand.<no memory space> [shape: f32[1,1], index: 2, kind: input, shape index: {}]   ;;  %s131_s3 = inlined_call_operand.vmem [shape: f32[8,1], index: 3, kind: output, shape index: {}]  }
   0x1   :  { %s15_s14 = sshll.u32 %s128_s0, 4  ;;  %s17_s16 = sshll.u32 %s91_s15, 4  ;;  %s16_s14 = int_to_ptr.hbm [resolvable:$true] %s15_s14  ;;  %s18_s16 = int_to_ptr.vmem [resolvable:$true] %s17_s16 }
   0x2   :  { %20 = dma.hbm_to_vmem [thread:$0]  %s16_s14, 128, %s18_s16, [#allocation5]  }
   0x3   :  { %89 = dma.done.wait [#allocation5], 128  }
   0x4   :  { %90 = vsyncadd [#allocation5], 4294967168  ;;  %vm33_vm0 = vcmask 7168   ;;  %v92_v0 = vmov 0.0   ;;  %v35_v1 = vld [vmem:[#allocation4] sm:$0xff]  ;;  %vm42_vm1 = vcmask 261120   ;;  %v54_v8 = vstv %s130_s2 }
   0x5   :  { %34 = vst.msk [vmem:[#allocation2] sm:$0xff] %vm33_vm0, %v92_v0  ;;  %v64_v2 = vld [vmem:[%s129_s1] ss:$0 sm:$0xff] }
   0x6   :  { %v40_v3 = vmul.f32 %v64_v2, %v35_v1 }
   0x8   :  { %v43_v4 = vsel %vm42_vm1, %v40_v3, 0.0 }
   0x9   :  { %44 = vadd.xlane.f32.xlu0 %v43_v4 }
   0xc   :  { %v41_v5 = vld [vmem:[#allocation2] sm:$0xff] }
  0x7c   :  { %v45_v6 = vpop.xlane.xlu0 %44 }
  0x7d   :  { %v46_v7 = vadd.f32 %v45_v6, %v41_v5 }
  0x7f   :  { %48 = vst.msk [vmem:[#allocation2] sm:$0xff] %vm33_vm0, %v46_v7 }
  0x86   :  { %v52_v9 = vld [vmem:[#allocation2] sm:$0xff] }
  0x87   :  { %v55_v10 = vadd.f32 %v54_v8, %v52_v9 }
  0x89   :  { %56 = vst.msk [vmem:[%s131_s3] sm:$0xff] %vm33_vm0, %v55_v10 }
  0x8a   :  { %61 = vsyncpa [#allocation5], 1 }

</bundles_post_ra>
